<compile_context>
chip_gen: v7x
topology: tpu7x:2x2x1
jax: 0.10.0
libtpu: 0.0.40
codegen_flags: <defaults>
</compile_context>

<pallas_src>
import jax
import jax.numpy as jnp
from jax import lax
from jax.experimental import pallas as pl
from jax.experimental.pallas import tpu as pltpu

_NEG_SLOPE = 0.01  # PyTorch leaky_relu default


def _round_up(v, m):
    return (v + m - 1) // m * m


def _leaky_relu(x):
    return jnp.where(x >= 0, x, _NEG_SLOPE * x)


# ---------------------------------------------------------------------------
# Fast path: the whole reduction (K) fits in one tile -> no accumulator needed.
# ---------------------------------------------------------------------------
def _fc_leaky_relu_single_k_kernel(x_ref, w_ref, b_ref, o_ref):
    # (tm, K) x (tn, K) contracted on dim 1 -> (tm, tn); MXU handles the
    # transposed contraction natively (no materialized weight.T anywhere).
    acc = lax.dot_general(
        x_ref[...],
        w_ref[...],
        dimension_numbers=(((1,), (1,)), ((), ())),
        preferred_element_type=jnp.float32,
    )
    acc = acc + b_ref[...].astype(jnp.float32)
    o_ref[...] = _leaky_relu(acc).astype(o_ref.dtype)


# ---------------------------------------------------------------------------
# General path: K split across grid axis 2 with an f32 VMEM accumulator.
# ---------------------------------------------------------------------------
def _fc_leaky_relu_multi_k_kernel(x_ref, w_ref, b_ref, o_ref, acc_ref):
    k = pl.program_id(2)

    @pl.when(k == 0)
    def _init():
        acc_ref[...] = jnp.zeros_like(acc_ref)

    acc_ref[...] += lax.dot_general(
        x_ref[...],
        w_ref[...],
        dimension_numbers=(((1,), (1,)), ((), ())),
        preferred_element_type=jnp.float32,
    )

    @pl.when(k == pl.num_programs(2) - 1)
    def _finalize():
        # Bias and nonlinearity only on the final K step (partial sums must
        # not see them).
        acc = acc_ref[...] + b_ref[...].astype(jnp.float32)
        o_ref[...] = _leaky_relu(acc).astype(o_ref.dtype)


def my_fc_forward(x, weight, bias):
    """x: (..., K); weight: (N, K)  [PyTorch nn.Linear layout]; bias: (N,)."""
    orig_shape = x.shape
    K = orig_shape[-1]
    N = weight.shape[0]
    x2 = x.reshape(-1, K)
    M = x2.shape[0]
    itemsize = jnp.dtype(x.dtype).itemsize

    # --- MXU/lane-aligned tile sizes (128-class; small dims use one tile) ---
    tm = min(128, _round_up(M, 8))      # sublane-aligned rows of x / out
    tn = min(256, _round_up(N, 128))    # lane-dense output columns
    tk = min(512, _round_up(K, 128))    # reduction chunk

    Mp = _round_up(M, tm)
    Np = _round_up(N, tn)
    Kp = _round_up(K, tk)

    # Zero-pad once in the wrapper; compute on zero rows/cols is free relative
    # to masked partial stores + underfilled MXU lanes.  Sliced back at the end.
    xp = jnp.pad(x2, ((0, Mp - M), (0, Kp - K)))
    wp = jnp.pad(weight, ((0, Np - N), (0, Kp - K)))
    bp = jnp.pad(bias, (0, Np - N)).reshape(1, Np)

    cost = pl.CostEstimate(
        flops=2 * Mp * Kp * Np,
        transcendentals=0,
        bytes_accessed=(xp.size + wp.size + bp.size + Mp * Np) * itemsize,
    )

    if Kp == tk:
        # -------- single-K fast path: 2D parallel grid, no scratch --------
        grid = (Mp // tm, Np // tn)
        out_p = pl.pallas_call(
            _fc_leaky_relu_single_k_kernel,
            out_shape=jax.ShapeDtypeStruct((Mp, Np), x.dtype),
            grid_spec=pltpu.PrefetchScalarGridSpec(
                num_scalar_prefetch=0,
                grid=grid,
                in_specs=[
                    # x tile:      (tm, Kp) at block (i, 0)
                    pl.BlockSpec((tm, Kp), lambda i, j: (i, 0)),
                    # weight tile: (tn, Kp) at block (j, 0) — native (N, K)
                    pl.BlockSpec((tn, Kp), lambda i, j: (j, 0)),
                    # bias tile:   (1, tn)  at block (0, j)
                    pl.BlockSpec((1, tn), lambda i, j: (0, j)),
                ],
                out_specs=pl.BlockSpec((tm, tn), lambda i, j: (i, j)),
            ),
            compiler_params=pltpu.CompilerParams(
                dimension_semantics=("parallel", "parallel"),
            ),
            cost_estimate=cost,
        )(xp, wp, bp)
    else:
        # -------- multi-K path: 3D grid with f32 VMEM accumulator --------
        grid = (Mp // tm, Np // tn, Kp // tk)
        out_p = pl.pallas_call(
            _fc_leaky_relu_multi_k_kernel,
            out_shape=jax.ShapeDtypeStruct((Mp, Np), x.dtype),
            grid_spec=pltpu.PrefetchScalarGridSpec(
                num_scalar_prefetch=0,
                grid=grid,
                in_specs=[
                    pl.BlockSpec((tm, tk), lambda i, j, k: (i, k)),
                    pl.BlockSpec((tn, tk), lambda i, j, k: (j, k)),
                    pl.BlockSpec((1, tn), lambda i, j, k: (0, j)),
                ],
                out_specs=pl.BlockSpec((tm, tn), lambda i, j, k: (i, j)),
                scratch_shapes=[pltpu.VMEM((tm, tn), jnp.float32)],
            ),
            compiler_params=pltpu.CompilerParams(
                # M, N independent (megacore-shardable); K is the reduction,
                # kept last in the grid.
                dimension_semantics=("parallel", "parallel", "arbitrary"),
            ),
            cost_estimate=cost,
        )(xp, wp, bp)

    out = out_p[:M, :N]
    return out.reshape(orig_shape[:-1] + (N,))


if __name__ == "__main__":
    key = jax.random.PRNGKey(0)
    k_x, k_w, k_b = jax.random.split(key, 3)

    B, input_dim, output_dim = 8, 32, 64

    # Deterministic synthetic parameters (same shapes as nn.Linear(input_dim, output_dim))
    x = jax.random.normal(k_x, (B, input_dim), dtype=jnp.float32)
    weight = jax.random.normal(k_w, (output_dim, input_dim), dtype=jnp.float32) * 0.1
    bias = jax.random.normal(k_b, (output_dim,), dtype=jnp.float32) * 0.1

    out = my_fc_forward(x, weight, bias)
    jax.block_until_ready(out)

    # Pure-JAX reference check
    ref = x @ weight.T + bias
    ref = jnp.where(ref >= 0, ref, 0.01 * ref)
    assert out.shape == ref.shape, "shape mismatch vs reference"
    assert jnp.allclose(out, ref, atol=1e-5, rtol=1e-5), "mismatch vs reference"

    # Also exercise the multi-K accumulator path with a larger reduction dim.
    B2, K2, N2 = 256, 1024, 384
    x2 = jax.random.normal(k_x, (B2, K2), dtype=jnp.float32)
    w2 = jax.random.normal(k_w, (N2, K2), dtype=jnp.float32) * 0.05
    b2 = jax.random.normal(k_b, (N2,), dtype=jnp.float32) * 0.1
    out2 = my_fc_forward(x2, w2, b2)
    jax.block_until_ready(out2)
    ref2 = x2 @ w2.T + b2
    ref2 = jnp.where(ref2 >= 0, ref2, 0.01 * ref2)
    assert jnp.allclose(out2, ref2, atol=1e-3, rtol=1e-3), "multi-K mismatch vs reference"

    print("KERNEL_OK")
</pallas_src>

<mosaic_0001>
module attributes {stable_mosaic.version = 11 : i64} {
  func.func @_fc_leaky_relu_single_k_kernel(%arg0: i32, %arg1: i32, %arg2: memref<8x128xf32, #tpu.memory_space<vmem>>, %arg3: memref<128x128xf32, #tpu.memory_space<vmem>>, %arg4: memref<1x128xf32, #tpu.memory_space<vmem>>, %arg5: memref<8x128xf32, #tpu.memory_space<vmem>>) attributes {dimension_semantics = [#tpu.dimension_semantics<parallel>, #tpu.dimension_semantics<parallel>], iteration_bounds = array<i64: 1, 1>, scalar_prefetch = 0 : i64, scratch_operands = 0 : i64, tpu.core_type = #tpu.core_type<tc>, window_params = [{transform_indices = @transform_0, window_bounds = array<i64: 8, 128>}, {transform_indices = @transform_1, window_bounds = array<i64: 128, 128>}, {transform_indices = @transform_2, window_bounds = array<i64: 1, 128>}, {transform_indices = @transform_3, window_bounds = array<i64: 8, 128>}]} {
    %c0 = arith.constant 0 : index
    %c0_0 = arith.constant 0 : index
    %0 = vector.load %arg2[%c0, %c0_0] : memref<8x128xf32, #tpu.memory_space<vmem>>, vector<8x128xf32>
    %c0_1 = arith.constant 0 : index
    %c0_2 = arith.constant 0 : index
    %1 = vector.load %arg3[%c0_1, %c0_2] : memref<128x128xf32, #tpu.memory_space<vmem>>, vector<128x128xf32>
    %cst = arith.constant dense<0.000000e+00> : vector<8x128xf32>
    %2 = tpu.matmul %0, %1, %cst {dimension_numbers = #tpu.dot_dimension_numbers<[1], [1], [0], [0], [0, 0, 1, 0], [], []>} : vector<8x128xf32>, vector<128x128xf32>, vector<8x128xf32> -> vector<8x128xf32>
    %c0_3 = arith.constant 0 : index
    %c0_4 = arith.constant 0 : index
    %3 = vector.load %arg4[%c0_3, %c0_4] : memref<1x128xf32, #tpu.memory_space<vmem>>, vector<1x128xf32>
    %4 = vector.broadcast %3 : vector<1x128xf32> to vector<8x128xf32>
    %5 = arith.addf %2, %4 : vector<8x128xf32>
    %cst_5 = arith.constant 0.000000e+00 : f32
    %6 = vector.broadcast %cst_5 : f32 to vector<8x128xf32>
    %7 = arith.cmpf oge, %5, %6 : vector<8x128xf32>
    %cst_6 = arith.constant 0.00999999977 : f32
    %8 = vector.broadcast %cst_6 : f32 to vector<8x128xf32>
    %9 = arith.mulf %8, %5 : vector<8x128xf32>
    %10 = arith.select %7, %5, %9 : vector<8x128xi1>, vector<8x128xf32>
    %c0_7 = arith.constant 0 : index
    %c0_8 = arith.constant 0 : index
    %11 = vector.load %arg5[%c0_7, %c0_8] : memref<8x128xf32, #tpu.memory_space<vmem>>, vector<8x128xf32>
    tpu.vector_store %arg5[%c0_7, %c0_8], %10 {strides = array<i32>} : memref<8x128xf32, #tpu.memory_space<vmem>>, vector<8x128xf32>,
    return
  }
  func.func @transform_0(%arg0: i32, %arg1: i32) -> (i32, i32) {
    %c0_i32 = arith.constant 0 : i32
    %c0_i32_0 = arith.constant 0 : i32
    return %arg0, %c0_i32 : i32, i32
  }
  func.func @transform_1(%arg0: i32, %arg1: i32) -> (i32, i32) {
    %c0_i32 = arith.constant 0 : i32
    %c0_i32_0 = arith.constant 0 : i32
    return %arg1, %c0_i32 : i32, i32
  }
  func.func @transform_2(%arg0: i32, %arg1: i32) -> (i32, i32) {
    %c0_i32 = arith.constant 0 : i32
    %c0_i32_0 = arith.constant 0 : i32
    return %c0_i32, %arg1 : i32, i32
  }
  func.func @transform_3(%arg0: i32, %arg1: i32) -> (i32, i32) {
    %c0_i32 = arith.constant 0 : i32
    return %arg0, %arg1 : i32, i32
  }
}

</mosaic_0001>

<bundles_post_ra>
// kernel: tpu_custom_call.1
= control target key start
LH: loop header
LB: loop body
LE: loop exit
PB: predicated region body
PF: predicated region fallthrough
CT: control target
= control target key end

     0   :  { %8 = vsyncpa [#allocation3], 0  ;;  %s386_s0 = inlined_call_operand.hbm [shape: f32[8,128], index: 0, kind: input, shape index: {}]   ;;  %s387_s1 = inlined_call_operand.hbm [shape: f32[128,128], index: 1, kind: input, shape index: {}]   ;;  %s388_s2 = inlined_call_operand.vmem [shape: f32[1,128], index: 2, kind: input, shape index: {}]   ;;  %s389_s3 = inlined_call_operand.hbm [shape: f32[8,128], index: 3, kind: output, shape index: {}]  }
   0x1   :  { %9 = vsyncpa [#allocation6], 0 }
   0x2   :  { %10 = vsyncpa [#allocation4], 0  ;;  %s312_s12 = smov [#allocation2]   ;;  %s313_s14 = smov [#allocation5]  }
   0x3   :  { %s17_s13 = sshll.u32 %s312_s12, 4  ;;  %s26_s15 = sshll.u32 %s313_s14, 4  ;;  %s18_s13 = int_to_ptr.vmem [resolvable:$true] %s17_s13  ;;  %s340_s15 = int_to_ptr.vmem [resolvable:$true] %s26_s15 }
   0x4   :  { %s240_s18 = scalar_lea.hbm %s386_s0, 128 }
   0x5   :  { %p241_p0 = scmp.ne.s32.totalorder %s386_s0, %s240_s18  ;;  %p244_p1 = scmp.lt.u32.totalorder %s240_s18, %s386_s0 }
   0x7   :  { %p246_p2 = pnand %p244_p1, %p241_p0 }
   0x9   :  { %249 = shalt.err (!%p246_p2)
}
   0xa   :  { %s250_s23 = scalar_lea.vmem %s18_s13, 128  ;;  %p255_p4 = scmp.lt.s32.totalorder %s18_s13, %s18_s13 }
   0xb   :  { %p251_p3 = scmp.ne.s32.totalorder %s18_s13, %s250_s23  ;;  %p256_p5 = scmp.lt.s32.totalorder %s250_s23, %s250_s23 }
   0xd   :  { %p257_p6 = por %p256_p5, %p255_p4 }
   0xf   :  { %p258_p7 = pnand %p257_p6, %p251_p3 }
  0x11   :  { %261 = shalt.err (!%p258_p7)
}
  0x12   :  { %20 = dma.hbm_to_vmem [thread:$0]  %s386_s0, 128, %s18_s13, [#allocation3]  }
  0x13   :  { %s262_s28 = scalar_lea.hbm %s387_s1, 2048 }
  0x14   :  { %p263_p8 = scmp.ne.s32.totalorder %s387_s1, %s262_s28  ;;  %p266_p9 = scmp.lt.u32.totalorder %s262_s28, %s387_s1 }
  0x16   :  { %p268_p10 = pnand %p266_p9, %p263_p8 }
  0x18   :  { %271 = shalt.err (!%p268_p10)
}
  0x19   :  { %s272_s6 = scalar_lea.vmem %s340_s15, 2048  ;;  %p277_p12 = scmp.lt.s32.totalorder %s340_s15, %s340_s15 }
  0x1a   :  { %p273_p11 = scmp.ne.s32.totalorder %s340_s15, %s272_s6  ;;  %p278_p13 = scmp.lt.s32.totalorder %s272_s6, %s272_s6 }
  0x1c   :  { %p279_p0 = por %p278_p13, %p277_p12 }
  0x1e   :  { %p280_p1 = pnand %p279_p0, %p273_p11 }
  0x20   :  { %283 = shalt.err (!%p280_p1)
}
  0x21   :  { %s314_s0 = smov 128   ;;  %s315_s7 = smov 8  }
  0x22   :  { %32 = dma.hbm_to_vmem [thread:$0]  %s387_s1, 2048, %s340_s15, [#allocation6], %s314_s0, %s314_s0, %s315_s7  }
  0x23   :  { %306 = dma.done.wait [#allocation3], 128  }
  0x24   :  { %307 = vsyncadd [#allocation3], 4294967168 }
  0x25   :  { %308 = dma.done.wait [#allocation6], 2048  }
  0x26   :  { %309 = vsyncadd [#allocation6], 4294965248  ;;  %v316_v0 = vmov 0.0|0.0   ;;  %vm317_vm0 = vmmov 0   ;;  %v318_v1 = vmov 0.0   ;;  %v42_v2 = vld [vmem:[#allocation5] sm:$0xff] }
  0x27   :  { %208 = vmatprep.subr.bf16.mxu0 %v316_v0  ;;  %205 = vmatprep.mubr.msk.f32.mxu0 %vm317_vm0, %v318_v1  ;;  %v43_v3 = vld [vmem:[#allocation5 + $0x8] sm:$0xff]  ;;  %v44_v5 = vld [vmem:[#allocation5 + $0x10] sm:$0xff]  ;;  %v45_v6 = vld [vmem:[#allocation5 + $0x18] sm:$0xff]  ;;  %s319_s11 = smov [#allocation7]  }
  0x28   :  { %v209_v4 = vpack.c.bf16 %v43_v3, %v42_v2  ;;  %v212_v7 = vpack.c.bf16 %v45_v6, %v44_v5  ;;  %v46_v8 = vld [vmem:[#allocation5 + $0x20] sm:$0xff]  ;;  %v47_v9 = vld [vmem:[#allocation5 + $0x28] sm:$0xff]  ;;  %v48_v11 = vld [vmem:[#allocation5 + $0x30] sm:$0xff]  ;;  %s145_s12 = sshll.u32 %s319_s11, 4  ;;  %s146_s12 = int_to_ptr.vmem [resolvable:$true] %s145_s12 }
  0x29   :  { %v215_v10 = vpack.c.bf16 %v47_v9, %v46_v8  ;;  %v49_v12 = vld [vmem:[#allocation5 + $0x38] sm:$0xff]  ;;  %v50_v14 = vld [vmem:[#allocation5 + $0x40] sm:$0xff]  ;;  %v51_v15 = vld [vmem:[#allocation5 + $0x48] sm:$0xff]  ;;  %s284_s13 = scalar_lea.vmem %s146_s12, 128  ;;  %p289_p3 = scmp.lt.s32.totalorder %s146_s12, %s146_s12 }
  0x2a   :  { %210 = vmatpush3.bf16.xpose.msra.mxu0 %v209_v4  ;;  %v218_v13 = vpack.c.bf16 %v49_v12, %v48_v11  ;;  %v221_v16 = vpack.c.bf16 %v51_v15, %v50_v14  ;;  %v52_v17 = vld [vmem:[#allocation5 + $0x50] sm:$0xff]  ;;  %v53_v18 = vld [vmem:[#allocation5 + $0x58] sm:$0xff]  ;;  %v54_v20 = vld [vmem:[#allocation5 + $0x60] sm:$0xff]  ;;  %p285_p2 = scmp.ne.s32.totalorder %s146_s12, %s284_s13  ;;  %p290_p4 = scmp.lt.s32.totalorder %s284_s13, %s284_s13 }
  0x2b   :  { %211 = vmatprep.subr.bf16.mxu0 %v316_v0  ;;  %v224_v19 = vpack.c.bf16 %v53_v18, %v52_v17  ;;  %v55_v21 = vld [vmem:[#allocation5 + $0x68] sm:$0xff]  ;;  %v56_v23 = vld [vmem:[#allocation5 + $0x70] sm:$0xff]  ;;  %v57_v24 = vld [vmem:[#allocation5 + $0x78] sm:$0xff] }
  0x2c   :  { %v227_v22 = vpack.c.bf16 %v55_v21, %v54_v20  ;;  %v230_v25 = vpack.c.bf16 %v57_v24, %v56_v23  ;;  %v41_v26 = vld [vmem:[#allocation2] sm:$0xff]  ;;  %p291_p5 = por %p290_p4, %p289_p3 }
  0x2d   :  { %v155_v27 = vld [vmem:[%s388_s2] ss:$0 sm:$0xff] }
  0x2e   :  { %p292_p6 = pnand %p291_p5, %p285_p2 }
  0x32   :  { %213 = vmatpush3.bf16.xpose.msra.mxu0 %v212_v7 }
  0x33   :  { %214 = vmatprep.subr.bf16.mxu0 %v316_v0 }
  0x3a   :  { %216 = vmatpush3.bf16.xpose.msra.mxu0 %v215_v10 }
  0x3b   :  { %217 = vmatprep.subr.bf16.mxu0 %v316_v0 }
  0x42   :  { %219 = vmatpush3.bf16.xpose.msra.mxu0 %v218_v13 }
  0x43   :  { %220 = vmatprep.subr.bf16.mxu0 %v316_v0 }
  0x4a   :  { %222 = vmatpush3.bf16.xpose.msra.mxu0 %v221_v16 }
  0x4b   :  { %223 = vmatprep.subr.bf16.mxu0 %v316_v0 }
  0x52   :  { %225 = vmatpush3.bf16.xpose.msra.mxu0 %v224_v19 }
  0x53   :  { %226 = vmatprep.subr.bf16.mxu0 %v316_v0 }
  0x5a   :  { %228 = vmatpush3.bf16.xpose.msra.mxu0 %v227_v22 }
  0x5b   :  { %229 = vmatprep.subr.bf16.mxu0 %v316_v0 }
  0x62   :  { %231 = vmatpush3.bf16.xpose.msra.mxu0 %v230_v25 }
  0x69   :  { %206 = vmatmul.mubr.f32.vlgmr.msra.gmra.mrb[0].mxu0 %v41_v26 }
 0x13c   :  { %v131_v28 = vpop.f32.mrb[0].mxu0 }
 0x13d   :  { %v132_v29 = vadd.f32 %v155_v27, %v131_v28  ;;  %v207_v30 = vpop.f32.mrb[1].mxu0 }
 0x13f   :  { %v136_v31 = vmul.f32 0.01, %v132_v29  ;;  %vm135_vm1 = vcmp.ge.f32.partialorder %v132_v29, 0.0 }
 0x141   :  { %v137_v32 = vsel %vm135_vm1, %v132_v29, %v136_v31 }
 0x142   :  { %138 = vst [vmem:[#allocation7] sm:$0xff] %v137_v32 }
 0x143   :  { %295 = shalt.err (!%p292_p6)
}
 0x144   :  { %s296_s2 = scalar_lea.hbm %s389_s3, 128 }
 0x145   :  { %p297_p7 = scmp.ne.s32.totalorder %s389_s3, %s296_s2  ;;  %p300_p8 = scmp.lt.u32.totalorder %s296_s2, %s389_s3 }
 0x147   :  { %p302_p9 = pnand %p300_p8, %p297_p7 }
 0x149   :  { %305 = shalt.err (!%p302_p9)
}
 0x14a   :  { %148 = dma.vmem_to_hbm [thread:$0]  %s146_s12, 128, %s389_s3, [#allocation4]  }
 0x14b   :  { %310 = dma.done.wait [#allocation4], 128  }
 0x14c   :  { %311 = vsyncadd [#allocation4], 4294967168 }
 0x14d   :  { %152 = vsyncpa [#allocation3], 1 }
 0x14e   :  { %153 = vsyncpa [#allocation6], 1 }
 0x14f   :  { %154 = vsyncpa [#allocation4], 1 }

</bundles_post_ra>
